<compile_context>
chip_gen: v5e
topology: v5e:2x2
jax: 0.10.0
libtpu: 0.0.40
codegen_flags: <defaults>
</compile_context>

<pallas_src>
import numpy as np
import jax
import jax.numpy as jnp
from jax.experimental import pallas as pl
from jax.experimental.pallas import tpu as pltpu


def _round_up(x, m):
    return (x + m - 1) // m * m


def _vmem_capacity_bytes():
    """Per-TensorCore VMEM capacity; conservative fallback if the query fails."""
    try:
        return int(pltpu.get_tpu_info().vmem_capacity_bytes)
    except Exception:
        return 64 << 20  # v7x per-TC value: safe lower bound for all gens


# ---------------------------------------------------------------------------
# Kernels
# ---------------------------------------------------------------------------
def _mlp_kernel(x_ref, w1_ref, b1_ref, w2_ref, b2_ref, o_ref):
    # Layer 1: h = relu(x @ W1 + b1). x cast to the MXU dtype in-kernel.
    x = x_ref[...].astype(w1_ref.dtype)
    h = jnp.dot(x, w1_ref[...], preferred_element_type=jnp.float32)
    h = jnp.maximum(h + b1_ref[...], 0.0).astype(w2_ref.dtype)
    # Layer 2: y = h @ W2 + b2 (f32 accumulation on the MXU).
    y = jnp.dot(h, w2_ref[...], preferred_element_type=jnp.float32)
    o_ref[...] = (y + b2_ref[...]).astype(o_ref.dtype)


def _mlp_kernel_hchunk(x_ref, w1_ref, b1_ref, w2_ref, b2_ref, o_ref, acc_ref):
    # Hidden dim tiled across grid axis 1 ("arbitrary"): accumulate
    # relu(x@W1[:,hc]+b1[hc]) @ W2[hc,:] into an f32 VMEM scratch.
    j = pl.program_id(1)

    @pl.when(j == 0)
    def _():
        acc_ref[...] = jnp.zeros_like(acc_ref)

    x = x_ref[...].astype(w1_ref.dtype)
    h = jnp.dot(x, w1_ref[...], preferred_element_type=jnp.float32)
    h = jnp.maximum(h + b1_ref[...], 0.0).astype(w2_ref.dtype)
    acc_ref[...] += jnp.dot(h, w2_ref[...], preferred_element_type=jnp.float32)

    @pl.when(j == pl.num_programs(1) - 1)
    def _():
        o_ref[...] = (acc_ref[...] + b2_ref[...]).astype(o_ref.dtype)


# ---------------------------------------------------------------------------
# Host-side wrappers
# ---------------------------------------------------------------------------
def prepare_params(w1, b1, w2, b2, *, compute_dtype=jnp.bfloat16):
    """Pad/cast the static parameters ONCE (keep out of the per-step hot path).

    w1: (D_in, H); b1: (H,) or (1, H); w2: (H, D_out); b2: (D_out,) or (1, D_out).
    """
    D_in, H = w1.shape
    D_out = w2.shape[1]
    D_in_p = _round_up(D_in, 128)
    H_p = _round_up(H, 128)
    D_out_p = _round_up(D_out, 128)
    # Zero padding is exact: padded rows/cols contribute 0 to the dots.
    w1p = jnp.pad(w1.astype(compute_dtype), ((0, D_in_p - D_in), (0, H_p - H)))
    w2p = jnp.pad(w2.astype(compute_dtype), ((0, H_p - H), (0, D_out_p - D_out)))
    b1p = jnp.pad(jnp.reshape(b1, (1, H)).astype(jnp.float32),
                  ((0, 0), (0, H_p - H)))
    b2p = jnp.pad(jnp.reshape(b2, (1, D_out)).astype(jnp.float32),
                  ((0, 0), (0, D_out_p - D_out)))
    return dict(w1=w1p, b1=b1p, w2=w2p, b2=b2p,
                dims=(D_in, H, D_out), pdims=(D_in_p, H_p, D_out_p),
                compute_dtype=compute_dtype)


def two_layer_forward(x, params, *, block_n=None, out_dtype=None, h_chunk=None):
    """Forward pass y = relu(x @ W1 + b1) @ W2 + b2 via a fused Pallas kernel.

    h_chunk: force the H-chunked accumulation path with this hidden-chunk size
             (testing / very large weights); must divide the padded H.
    """
    D_in, H, D_out = params["dims"]
    D_in_p, H_p, D_out_p = params["pdims"]
    compute_dtype = params["compute_dtype"]
    N = x.shape[0]
    assert x.shape[1] == D_in, (x.shape, D_in)
    out_dtype = x.dtype if out_dtype is None else out_dtype

    xbytes = np.dtype(x.dtype).itemsize
    cbytes = np.dtype(compute_dtype).itemsize
    obytes = np.dtype(out_dtype).itemsize

    # --- generation-aware VMEM budget --------------------------------------
    cap = _vmem_capacity_bytes()
    if cap <= (64 << 20):                     # v7x: 64 MiB per TensorCore
        budget, vmem_limit = 40 << 20, 48 << 20
        default_block_n = 512
    else:                                     # v5e / v6e: 128 MiB
        budget, vmem_limit = 96 << 20, 100 << 20
        default_block_n = 1024
    vmem_limit = int(min(vmem_limit, cap))
    block_n = default_block_n if block_n is None else block_n

    def vmem_bytes(tn, th, wmult):
        b = 2 * tn * D_in_p * xbytes              # x tiles (2-deep pipeline)
        b += 2 * tn * D_out_p * obytes            # out tiles (2-deep pipeline)
        b += wmult * (D_in_p * th + th * D_out_p) * cbytes   # weight panels
        b += wmult * th * 4 + D_out_p * 4         # f32 biases
        b += tn * D_out_p * 4                     # f32 accumulator / staging
        b += tn * th * 4 + tn * th * cbytes       # h (f32) + h cast to bf16
        b += tn * D_in_p * cbytes                 # in-kernel x cast
        b += 4 << 20                              # Mosaic internal scratch
        return b

    # --- batch tile: multiple of 8, >=2 grid steps when N allows, balanced --
    tn = max(8, min(_round_up(block_n, 8), _round_up(N, 8)))
    if N > 8:
        tn = min(tn, _round_up(pl.cdiv(N, 2), 8))   # pipelining + v7x megacore
    tn = _round_up(pl.cdiv(N, pl.cdiv(N, tn)), 8)   # balance: <8 padded rows/tile

    # --- resident weights vs. H-chunked accumulation ------------------------
    if h_chunk is not None:
        single = False
        th = int(h_chunk)
        assert H_p % th == 0 and th % 128 == 0, (H_p, th)
    else:
        single = vmem_bytes(tn, H_p, wmult=1) <= budget
        th = H_p
        if not single:
            # keep tn, shrink the (double-buffered) hidden chunk instead
            while th > 128 and vmem_bytes(tn, th, wmult=2) > budget:
                th = _round_up(th // 2, 128)
            best, c = 128, 128                   # th must divide H_p exactly
            while c <= th:
                if H_p % c == 0:
                    best = c
                c += 128
            th = best
            while tn > 8 and vmem_bytes(tn, th, wmult=2) > budget:
                tn = max(8, _round_up(tn // 2, 8))

    N_p = _round_up(N, tn)

    # --- pad x only when needed (skip the HBM round trip if aligned) --------
    if N_p != N or D_in_p != D_in:
        xk = jnp.pad(x, ((0, N_p - N), (0, D_in_p - D_in)))
    else:
        xk = x

    cost = pl.CostEstimate(
        flops=2 * N_p * (D_in_p * H_p + H_p * D_out_p),
        transcendentals=0,
        bytes_accessed=(N_p * D_in_p * xbytes
                        + (D_in_p * H_p + H_p * D_out_p) * cbytes
                        + (H_p + D_out_p) * 4
                        + N_p * D_out_p * obytes),
    )

    w1p, b1p, w2p, b2p = params["w1"], params["b1"], params["w2"], params["b2"]

    def run(single_buffer_resident):
        if single:
            def res_spec(shape):
                if single_buffer_resident:
                    return pl.BlockSpec(shape, lambda i: (0, 0),
                                        pipeline_mode=pl.Buffered(1))
                return pl.BlockSpec(shape, lambda i: (0, 0))

            return pl.pallas_call(
                _mlp_kernel,
                out_shape=jax.ShapeDtypeStruct((N_p, D_out_p), out_dtype),
                grid=(N_p // tn,),
                in_specs=[
                    pl.BlockSpec((tn, D_in_p), lambda i: (i, 0)),  # x: tiled N
                    res_spec((D_in_p, H_p)),                       # W1 resident
                    res_spec((1, H_p)),                            # b1 resident
                    res_spec((H_p, D_out_p)),                      # W2 resident
                    res_spec((1, D_out_p)),                        # b2 resident
                ],
                out_specs=pl.BlockSpec((tn, D_out_p), lambda i: (i, 0)),
                compiler_params=pltpu.CompilerParams(
                    dimension_semantics=("parallel",),
                    vmem_limit_bytes=vmem_limit,
                ),
                cost_estimate=cost,
            )(xk, w1p, b1p, w2p, b2p)

        # H-chunked path: grid = (batch tiles, hidden chunks), f32 accumulator.
        if single_buffer_resident:
            b2_spec = pl.BlockSpec((1, D_out_p), lambda i, j: (0, 0),
                                   pipeline_mode=pl.Buffered(1))
        else:
            b2_spec = pl.BlockSpec((1, D_out_p), lambda i, j: (0, 0))

        return pl.pallas_call(
            _mlp_kernel_hchunk,
            out_shape=jax.ShapeDtypeStruct((N_p, D_out_p), out_dtype),
            grid=(N_p // tn, H_p // th),
            in_specs=[
                pl.BlockSpec((tn, D_in_p), lambda i, j: (i, 0)),   # x (no re-DMA over j)
                pl.BlockSpec((D_in_p, th), lambda i, j: (0, j)),   # W1 chunk
                pl.BlockSpec((1, th), lambda i, j: (0, j)),        # b1 chunk
                pl.BlockSpec((th, D_out_p), lambda i, j: (j, 0)),  # W2 chunk
                b2_spec,                                           # b2 resident
            ],
            out_specs=pl.BlockSpec((tn, D_out_p), lambda i, j: (i, 0)),
            scratch_shapes=[pltpu.VMEM((tn, D_out_p), jnp.float32)],
            compiler_params=pltpu.CompilerParams(
                dimension_semantics=("parallel", "arbitrary"),
                vmem_limit_bytes=vmem_limit,
            ),
            cost_estimate=cost,
        )(xk, w1p, b1p, w2p, b2p)

    try:
        out = run(single_buffer_resident=True)
    except Exception:
        # pl.Buffered(1) unsupported on this jax build: fall back to the
        # default 2-deep pipeline for the resident operands.
        out = run(single_buffer_resident=False)

    if N_p != N or D_out_p != D_out:
        out = out[:N, :D_out]
    return out


def init_params(key, D_in, H, D_out, dtype=jnp.float32):
    # nn.Linear default init: U(-1/sqrt(fan_in), 1/sqrt(fan_in)).
    k1, k2, k3, k4 = jax.random.split(key, 4)
    bound1 = 1.0 / jnp.sqrt(D_in)
    bound2 = 1.0 / jnp.sqrt(H)
    w1 = jax.random.uniform(k1, (D_in, H), dtype, -bound1, bound1)
    b1 = jax.random.uniform(k2, (1, H), dtype, -bound1, bound1)
    w2 = jax.random.uniform(k3, (H, D_out), dtype, -bound2, bound2)
    b2 = jax.random.uniform(k4, (1, D_out), dtype, -bound2, bound2)
    return w1, b1, w2, b2


def _ref_forward(x, w1, b1, w2, b2):
    # Same bf16-rounded operands the kernel feeds the MXU, f32 accumulation.
    f32 = jnp.float32
    xb = x.astype(jnp.bfloat16).astype(f32)
    w1b = w1.astype(jnp.bfloat16).astype(f32)
    w2b = w2.astype(jnp.bfloat16).astype(f32)
    h = jnp.maximum(xb @ w1b + b1.reshape(1, -1).astype(f32), 0.0)
    h = h.astype(jnp.bfloat16).astype(f32)
    return h @ w2b + b2.reshape(1, -1).astype(f32)


if __name__ == "__main__":
    key = jax.random.PRNGKey(0)

    # --- main demo (matches the PyTorch module at small shapes) -------------
    N, D_in, H, D_out = 8, 32, 64, 16
    kx, kp, kx2, kp2 = jax.random.split(key, 4)
    x = jax.random.normal(kx, (N, D_in), jnp.float32)
    w1, b1, w2, b2 = init_params(kp, D_in, H, D_out)

    params = prepare_params(w1, b1, w2, b2)
    y = two_layer_forward(x, params)
    jax.block_until_ready(y)

    y_ref = _ref_forward(x, w1, b1, w2, b2)
    assert y.shape == (N, D_out)
    assert jnp.allclose(y, y_ref, atol=2e-3, rtol=2e-3), (
        float(jnp.max(jnp.abs(y - y_ref))))

    # --- also validate the H-chunked accumulation path (multi-step grid) ----
    N2, D_in2, H2, D_out2 = 16, 32, 256, 16
    x2 = jax.random.normal(kx2, (N2, D_in2), jnp.float32)
    w1b_, b1b_, w2b_, b2b_ = init_params(kp2, D_in2, H2, D_out2)
    params2 = prepare_params(w1b_, b1b_, w2b_, b2b_)
    y2 = two_layer_forward(x2, params2, h_chunk=128)
    jax.block_until_ready(y2)
    y2_ref = _ref_forward(x2, w1b_, b1b_, w2b_, b2b_)
    assert y2.shape == (N2, D_out2)
    assert jnp.allclose(y2, y2_ref, atol=2e-3, rtol=2e-3), (
        float(jnp.max(jnp.abs(y2 - y2_ref))))

    print("KERNEL_OK")
</pallas_src>

<mosaic_0001>
module attributes {stable_mosaic.version = 11 : i64} {
  func.func @_mlp_kernel(%arg0: i32, %arg1: memref<8x128xf32, #tpu.memory_space<vmem>>, %arg2: memref<128x128xbf16, #tpu.memory_space<vmem>>, %arg3: memref<1x128xf32, #tpu.memory_space<vmem>>, %arg4: memref<128x128xbf16, #tpu.memory_space<vmem>>, %arg5: memref<1x128xf32, #tpu.memory_space<vmem>>, %arg6: memref<8x128xf32, #tpu.memory_space<vmem>>) attributes {dimension_semantics = [#tpu.dimension_semantics<parallel>], iteration_bounds = array<i64: 1>, scalar_prefetch = 0 : i64, scratch_operands = 0 : i64, tpu.core_type = #tpu.core_type<tc>, window_params = [{transform_indices = @transform_0, window_bounds = array<i64: 8, 128>}, {pipeline_mode = #tpu.pipeline_mode<synchronous>, transform_indices = @transform_1, window_bounds = array<i64: 128, 128>}, {pipeline_mode = #tpu.pipeline_mode<synchronous>, transform_indices = @transform_2, window_bounds = array<i64: 1, 128>}, {pipeline_mode = #tpu.pipeline_mode<synchronous>, transform_indices = @transform_3, window_bounds = array<i64: 128, 128>}, {pipeline_mode = #tpu.pipeline_mode<synchronous>, transform_indices = @transform_4, window_bounds = array<i64: 1, 128>}, {transform_indices = @transform_5, window_bounds = array<i64: 8, 128>}]} {
    %c0 = arith.constant 0 : index
    %c0_0 = arith.constant 0 : index
    %0 = vector.load %arg1[%c0, %c0_0] : memref<8x128xf32, #tpu.memory_space<vmem>>, vector<8x128xf32>
    %1 = arith.truncf %0 : vector<8x128xf32> to vector<8x128xbf16>
    %c0_1 = arith.constant 0 : index
    %c0_2 = arith.constant 0 : index
    %2 = vector.load %arg2[%c0_1, %c0_2] : memref<128x128xbf16, #tpu.memory_space<vmem>>, vector<128x128xbf16>
    %cst = arith.constant dense<0.000000e+00> : vector<8x128xf32>
    %3 = tpu.matmul %1, %2, %cst {dimension_numbers = #tpu.dot_dimension_numbers<[1], [0], [0], [1], [0, 0, 1, 1], [], []>} : vector<8x128xbf16>, vector<128x128xbf16>, vector<8x128xf32> -> vector<8x128xf32>
    %c0_3 = arith.constant 0 : index
    %c0_4 = arith.constant 0 : index
    %4 = vector.load %arg3[%c0_3, %c0_4] : memref<1x128xf32, #tpu.memory_space<vmem>>, vector<1x128xf32>
    %5 = vector.broadcast %4 : vector<1x128xf32> to vector<8x128xf32>
    %6 = arith.addf %3, %5 : vector<8x128xf32>
    %cst_5 = arith.constant 0.000000e+00 : f32
    %7 = vector.broadcast %cst_5 : f32 to vector<8x128xf32>
    %8 = arith.maximumf %6, %7 : vector<8x128xf32>
    %9 = arith.truncf %8 : vector<8x128xf32> to vector<8x128xbf16>
    %c0_6 = arith.constant 0 : index
    %c0_7 = arith.constant 0 : index
    %10 = vector.load %arg4[%c0_6, %c0_7] : memref<128x128xbf16, #tpu.memory_space<vmem>>, vector<128x128xbf16>
    %cst_8 = arith.constant dense<0.000000e+00> : vector<8x128xf32>
    %11 = tpu.matmul %9, %10, %cst_8 {dimension_numbers = #tpu.dot_dimension_numbers<[1], [0], [0], [1], [0, 0, 1, 1], [], []>} : vector<8x128xbf16>, vector<128x128xbf16>, vector<8x128xf32> -> vector<8x128xf32>
    %c0_9 = arith.constant 0 : index
    %c0_10 = arith.constant 0 : index
    %12 = vector.load %arg5[%c0_9, %c0_10] : memref<1x128xf32, #tpu.memory_space<vmem>>, vector<1x128xf32>
    %13 = vector.broadcast %12 : vector<1x128xf32> to vector<8x128xf32>
    %14 = arith.addf %11, %13 : vector<8x128xf32>
    %c0_11 = arith.constant 0 : index
    %c0_12 = arith.constant 0 : index
    %15 = vector.load %arg6[%c0_11, %c0_12] : memref<8x128xf32, #tpu.memory_space<vmem>>, vector<8x128xf32>
    tpu.vector_store %arg6[%c0_11, %c0_12], %14 {strides = array<i32>} : memref<8x128xf32, #tpu.memory_space<vmem>>, vector<8x128xf32>,
    return
  }
  func.func @transform_0(%arg0: i32) -> (i32, i32) {
    %c0_i32 = arith.constant 0 : i32
    %c0_i32_0 = arith.constant 0 : i32
    return %arg0, %c0_i32 : i32, i32
  }
  func.func @transform_1(%arg0: i32) -> (i32, i32) {
    %c0_i32 = arith.constant 0 : i32
    %c0_i32_0 = arith.constant 0 : i32
    %c0_i32_1 = arith.constant 0 : i32
    return %c0_i32, %c0_i32_0 : i32, i32
  }
  func.func @transform_2(%arg0: i32) -> (i32, i32) {
    %c0_i32 = arith.constant 0 : i32
    %c0_i32_0 = arith.constant 0 : i32
    %c0_i32_1 = arith.constant 0 : i32
    return %c0_i32, %c0_i32_0 : i32, i32
  }
  func.func @transform_3(%arg0: i32) -> (i32, i32) {
    %c0_i32 = arith.constant 0 : i32
    %c0_i32_0 = arith.constant 0 : i32
    %c0_i32_1 = arith.constant 0 : i32
    return %c0_i32, %c0_i32_0 : i32, i32
  }
  func.func @transform_4(%arg0: i32) -> (i32, i32) {
    %c0_i32 = arith.constant 0 : i32
    %c0_i32_0 = arith.constant 0 : i32
    %c0_i32_1 = arith.constant 0 : i32
    return %c0_i32, %c0_i32_0 : i32, i32
  }
  func.func @transform_5(%arg0: i32) -> (i32, i32) {
    %c0_i32 = arith.constant 0 : i32
    %c0_i32_0 = arith.constant 0 : i32
    return %arg0, %c0_i32 : i32, i32
  }
}

module attributes {stable_mosaic.version = 11 : i64} {
  func.func @_mlp_kernel(%arg0: i32, %arg1: memref<8x128xf32, #tpu.memory_space<vmem>>, %arg2: memref<128x128xbf16, #tpu.memory_space<vmem>>, %arg3: memref<1x128xf32, #tpu.memory_space<vmem>>, %arg4: memref<128x128xbf16, #tpu.memory_space<vmem>>, %arg5: memref<1x128xf32, #tpu.memory_space<vmem>>, %arg6: memref<8x128xf32, #tpu.memory_space<vmem>>) attributes {dimension_semantics = [#tpu.dimension_semantics<parallel>], iteration_bounds = array<i64: 1>, scalar_prefetch = 0 : i64, scratch_operands = 0 : i64, tpu.core_type = #tpu.core_type<tc>, window_params = [{transform_indices = @transform_0, window_bounds = array<i64: 8, 128>}, {pipeline_mode = #tpu.pipeline_mode<synchronous>, transform_indices = @transform_1, window_bounds = array<i64: 128, 128>}, {pipeline_mode = #tpu.pipeline_mode<synchronous>, transform_indices = @transform_2, window_bounds = array<i64: 1, 128>}, {pipeline_mode = #tpu.pipeline_mode<synchronous>, transform_indices = @transform_3, window_bounds = array<i64: 128, 128>}, {pipeline_mode = #tpu.pipeline_mode<synchronous>, transform_indices = @transform_4, window_bounds = array<i64: 1, 128>}, {transform_indices = @transform_5, window_bounds = array<i64: 8, 128>}]} {
    %c0 = arith.constant 0 : index
    %c0_0 = arith.constant 0 : index
    %0 = vector.load %arg1[%c0, %c0_0] : memref<8x128xf32, #tpu.memory_space<vmem>>, vector<8x128xf32>
    %1 = arith.truncf %0 : vector<8x128xf32> to vector<8x128xbf16>
    %c0_1 = arith.constant 0 : index
    %c0_2 = arith.constant 0 : index
    %2 = vector.load %arg2[%c0_1, %c0_2] : memref<128x128xbf16, #tpu.memory_space<vmem>>, vector<128x128xbf16>
    %cst = arith.constant dense<0.000000e+00> : vector<8x128xf32>
    %3 = tpu.matmul %1, %2, %cst {dimension_numbers = #tpu.dot_dimension_numbers<[1], [0], [0], [1], [0, 0, 1, 1], [], []>} : vector<8x128xbf16>, vector<128x128xbf16>, vector<8x128xf32> -> vector<8x128xf32>
    %c0_3 = arith.constant 0 : index
    %c0_4 = arith.constant 0 : index
    %4 = vector.load %arg3[%c0_3, %c0_4] : memref<1x128xf32, #tpu.memory_space<vmem>>, vector<1x128xf32>
    %5 = vector.broadcast %4 : vector<1x128xf32> to vector<8x128xf32>
    %6 = arith.addf %3, %5 : vector<8x128xf32>
    %cst_5 = arith.constant 0.000000e+00 : f32
    %7 = vector.broadcast %cst_5 : f32 to vector<8x128xf32>
    %8 = arith.maximumf %6, %7 : vector<8x128xf32>
    %9 = arith.truncf %8 : vector<8x128xf32> to vector<8x128xbf16>
    %c0_6 = arith.constant 0 : index
    %c0_7 = arith.constant 0 : index
    %10 = vector.load %arg4[%c0_6, %c0_7] : memref<128x128xbf16, #tpu.memory_space<vmem>>, vector<128x128xbf16>
    %cst_8 = arith.constant dense<0.000000e+00> : vector<8x128xf32>
    %11 = tpu.matmul %9, %10, %cst_8 {dimension_numbers = #tpu.dot_dimension_numbers<[1], [0], [0], [1], [0, 0, 1, 1], [], []>} : vector<8x128xbf16>, vector<128x128xbf16>, vector<8x128xf32> -> vector<8x128xf32>
    %c0_9 = arith.constant 0 : index
    %c0_10 = arith.constant 0 : index
    %12 = vector.load %arg5[%c0_9, %c0_10] : memref<1x128xf32, #tpu.memory_space<vmem>>, vector<1x128xf32>
    %13 = vector.broadcast %12 : vector<1x128xf32> to vector<8x128xf32>
    %14 = arith.addf %11, %13 : vector<8x128xf32>
    %c0_11 = arith.constant 0 : index
    %c0_12 = arith.constant 0 : index
    %15 = vector.load %arg6[%c0_11, %c0_12] : memref<8x128xf32, #tpu.memory_space<vmem>>, vector<8x128xf32>
    tpu.vector_store %arg6[%c0_11, %c0_12], %14 {strides = array<i32>} : memref<8x128xf32, #tpu.memory_space<vmem>>, vector<8x128xf32>,
    return
  }
  func.func @transform_0(%arg0: i32) -> (i32, i32) {
    %c0_i32 = arith.constant 0 : i32
    %c0_i32_0 = arith.constant 0 : i32
    return %arg0, %c0_i32 : i32, i32
  }
  func.func @transform_1(%arg0: i32) -> (i32, i32) {
    %c0_i32 = arith.constant 0 : i32
    %c0_i32_0 = arith.constant 0 : i32
    %c0_i32_1 = arith.constant 0 : i32
    return %c0_i32, %c0_i32_0 : i32, i32
  }
  func.func @transform_2(%arg0: i32) -> (i32, i32) {
    %c0_i32 = arith.constant 0 : i32
    %c0_i32_0 = arith.constant 0 : i32
    %c0_i32_1 = arith.constant 0 : i32
    return %c0_i32, %c0_i32_0 : i32, i32
  }
  func.func @transform_3(%arg0: i32) -> (i32, i32) {
    %c0_i32 = arith.constant 0 : i32
    %c0_i32_0 = arith.constant 0 : i32
    %c0_i32_1 = arith.constant 0 : i32
    return %c0_i32, %c0_i32_0 : i32, i32
  }
  func.func @transform_4(%arg0: i32) -> (i32, i32) {
    %c0_i32 = arith.constant 0 : i32
    %c0_i32_0 = arith.constant 0 : i32
    %c0_i32_1 = arith.constant 0 : i32
    return %c0_i32, %c0_i32_0 : i32, i32
  }
  func.func @transform_5(%arg0: i32) -> (i32, i32) {
    %c0_i32 = arith.constant 0 : i32
    %c0_i32_0 = arith.constant 0 : i32
    return %arg0, %c0_i32 : i32, i32
  }
}

</mosaic_0001>

<bundles_post_ra>
// kernel: tpu_custom_call.1
= control target key start
LH: loop header
LB: loop body
LE: loop exit
PB: predicated region body
PF: predicated region fallthrough
CT: control target
= control target key end

     0   :  { %10 = vsyncpa [#allocation3], 0  ;;  %s495_s0 = inlined_call_operand.hbm [shape: f32[8,128], index: 0, kind: input, shape index: {}]   ;;  %s496_s1 = inlined_call_operand.hbm [shape: bf16[128,128], index: 1, kind: input, shape index: {}]   ;;  %s497_s2 = inlined_call_operand.vmem [shape: f32[1,128], index: 2, kind: input, shape index: {}]   ;;  %s498_s3 = inlined_call_operand.hbm [shape: bf16[128,128], index: 3, kind: input, shape index: {}]   ;;  %s499_s4 = inlined_call_operand.vmem [shape: f32[1,128], index: 4, kind: input, shape index: {}]   ;;  %s500_s5 = inlined_call_operand.hbm [shape: f32[8,128], index: 5, kind: output, shape index: {}]  }
   0x1   :  { %11 = vsyncpa [#allocation6], 0  ;;  %s28_s20 = sshll.u32 %s496_s1, 4  ;;  %s29_s20 = int_to_ptr.hbm [resolvable:$true] %s28_s20 }
   0x2   :  { %12 = vsyncpa [#allocation4], 0  ;;  %s441_s21 = smov [#allocation5]   ;;  %s18_s25 = sshll.u32 %s495_s0, 4  ;;  %s19_s25 = int_to_ptr.hbm [resolvable:$true] %s18_s25 }
   0x3   :  { %s30_s22 = sshll.u32 %s441_s21, 4  ;;  %s442_s26 = smov 64   ;;  %s31_s22 = int_to_ptr.vmem [resolvable:$true] %s30_s22 }
   0x4   :  { %s443_s27 = smov 4   ;;  %s444_s28 = smov [#allocation2]  }
   0x5   :  { %36 = dma.hbm_to_vmem [thread:$0]  %s29_s20, 1024, %s31_s22, [#allocation6], %s442_s26, %s442_s26, %s443_s27  }
   0x6   :  { %s20_s29 = sshll.u32 %s444_s28, 4  ;;  %s43_s7 = sshll.u32 %s498_s3, 4  ;;  %s21_s29 = int_to_ptr.vmem [resolvable:$true] %s20_s29  ;;  %s44_s7 = int_to_ptr.hbm [resolvable:$true] %s43_s7 }
   0x7   :  { %23 = dma.hbm_to_vmem [thread:$0]  %s19_s25, 128, %s21_s29, [#allocation3]  }
   0x8   :  { %s445_s1 = smov [#allocation7]  }
   0x9   :  { %s45_s8 = sshll.u32 %s445_s1, 4  ;;  %s46_s8 = int_to_ptr.vmem [resolvable:$true] %s45_s8 }
   0xa   :  { %51 = dma.hbm_to_vmem [thread:$0]  %s44_s7, 1024, %s46_s8, [#allocation6], %s442_s26, %s442_s26, %s443_s27  }
   0xb   :  { %435 = dma.done.wait [#allocation3], 128  }
   0xc   :  { %436 = vsyncadd [#allocation3], 4294967168 }
   0xd   :  { %437 = dma.done.wait [#allocation6], 2048  }
   0xe   :  { %438 = vsyncadd [#allocation6], 4294965248  ;;  %v322_v0 = vld [vmem:[#allocation5 + $0x38] sm:$0xff]  ;;  %v321_v1 = vld [vmem:[#allocation5 + $0x30] sm:$0xff]  ;;  %s446_s11 = smov [#allocation8]   ;;  %s240_s15 = sshll.u32 %s500_s5, 4  ;;  %s241_s15 = int_to_ptr.hbm [resolvable:$true] %s240_s15 }
   0xf   :  { %136 = vmatpush.bf16.msra.mxu0 %v322_v0  ;;  %v330_v2 = vld [vmem:[#allocation7 + $0x38] sm:$0xff]  ;;  %v329_v3 = vld [vmem:[#allocation7 + $0x30] sm:$0xff]  ;;  %v320_v4 = vld [vmem:[#allocation5 + $0x28] sm:$0xff]  ;;  %s238_s12 = sshll.u32 %s446_s11, 4  ;;  %s239_s12 = int_to_ptr.vmem [resolvable:$true] %s238_s12 }
  0x10   :  { %219 = vmatpush.bf16.msra.mxu1 %v330_v2  ;;  %v328_v5 = vld [vmem:[#allocation7 + $0x28] sm:$0xff]  ;;  %v319_v6 = vld [vmem:[#allocation5 + $0x20] sm:$0xff]  ;;  %v318_v8 = vld [vmem:[#allocation5 + $0x18] sm:$0xff] }
  0x11   :  { %v327_v7 = vld [vmem:[#allocation7 + $0x20] sm:$0xff]  ;;  %v326_v9 = vld [vmem:[#allocation7 + $0x18] sm:$0xff]  ;;  %v317_v10 = vld [vmem:[#allocation5 + $0x10] sm:$0xff] }
  0x12   :  { %v325_v11 = vld [vmem:[#allocation7 + $0x10] sm:$0xff]  ;;  %v316_v12 = vld [vmem:[#allocation5 + $0x8] sm:$0xff]  ;;  %v315_v13 = vld [vmem:[#allocation5] sm:$0xff] }
  0x13   :  { %137 = vmatpush.bf16.msra.mxu0 %v321_v1  ;;  %v66_v14 = vld [vmem:[#allocation2] sm:$0xff]  ;;  %v324_v16 = vld [vmem:[#allocation7 + $0x8] sm:$0xff]  ;;  %v323_v17 = vld [vmem:[#allocation7] sm:$0xff] }
  0x14   :  { %220 = vmatpush.bf16.msra.mxu1 %v329_v3  ;;  %v67_v15 = vpack.c.bf16 %v66_v14, %v66_v14  ;;  %v337_v18 = vld [vmem:[%s497_s2] ss:$0 sm:$0xff] }
  0x15   :  { %v338_v24 = vld [vmem:[%s499_s4] ss:$0 sm:$0xff] }
  0x17   :  { %138 = vmatpush.bf16.msra.mxu0 %v320_v4 }
  0x18   :  { %221 = vmatpush.bf16.msra.mxu1 %v328_v5 }
  0x1b   :  { %139 = vmatpush.bf16.msra.mxu0 %v319_v6 }
  0x1c   :  { %222 = vmatpush.bf16.msra.mxu1 %v327_v7 }
  0x1f   :  { %140 = vmatpush.bf16.msra.mxu0 %v318_v8 }
  0x20   :  { %223 = vmatpush.bf16.msra.mxu1 %v326_v9 }
  0x23   :  { %141 = vmatpush.bf16.msra.mxu0 %v317_v10 }
  0x24   :  { %224 = vmatpush.bf16.msra.mxu1 %v325_v11 }
  0x27   :  { %142 = vmatpush.bf16.msra.mxu0 %v316_v12 }
  0x28   :  { %225 = vmatpush.bf16.msra.mxu1 %v324_v16 }
  0x2b   :  { %143 = vmatpush.bf16.msra.mxu0 %v315_v13 }
  0x2c   :  { %226 = vmatpush.bf16.msra.mxu1 %v323_v17 }
  0x2e   :  { %144 = vmatmul.bf16.vlgmr.msra.gmra.mxu0 %v67_v15 }
  0xab   :  { %v145_v19 = vpop.f32.mrf.mxu0 }
  0xac   :  { %v146_v20 = vadd.f32 %v337_v18, %v145_v19 }
  0xae   :  { %v149_v21 = vmax.f32 %v146_v20, 0.0 }
  0xb0   :  { %v150_v22 = vpack.c.bf16 %v149_v21, %v149_v21 }
  0xb2   :  { %227 = vmatmul.bf16.vlgmr.msra.gmra.mxu1 %v150_v22 }
  0xb3   :  { %v147_v23 = vpop.f32.mrf.mxu0 }
 0x12f   :  { %v228_v25 = vpop.f32.mrf.mxu1 }
 0x130   :  { %v229_v26 = vadd.f32 %v338_v24, %v228_v25 }
 0x132   :  { %232 = vst [vmem:[#allocation8] sm:$0xff] %v229_v26 }
 0x133   :  { %243 = dma.vmem_to_hbm [thread:$0]  %s239_s12, 128, %s241_s15, [#allocation4]  }
 0x137   :  { %v230_v27 = vpop.f32.mrf.mxu1 }
 0x138   :  { %439 = dma.done.wait [#allocation4], 128  }
 0x139   :  { %440 = vsyncadd [#allocation4], 4294967168 }
 0x13a   :  { %248 = vsyncpa [#allocation3], 1 }
 0x13b   :  { %249 = vsyncpa [#allocation6], 1 }
 0x13c   :  { %250 = vsyncpa [#allocation4], 1 }

// kernel: tpu_custom_call.1
= control target key start
LH: loop header
LB: loop body
LE: loop exit
PB: predicated region body
PF: predicated region fallthrough
CT: control target
= control target key end

     0   :  { %10 = vsyncpa [#allocation3], 0  ;;  %s495_s0 = inlined_call_operand.hbm [shape: f32[8,128], index: 0, kind: input, shape index: {}]   ;;  %s496_s1 = inlined_call_operand.hbm [shape: bf16[128,128], index: 1, kind: input, shape index: {}]   ;;  %s497_s2 = inlined_call_operand.vmem [shape: f32[1,128], index: 2, kind: input, shape index: {}]   ;;  %s498_s3 = inlined_call_operand.hbm [shape: bf16[128,128], index: 3, kind: input, shape index: {}]   ;;  %s499_s4 = inlined_call_operand.vmem [shape: f32[1,128], index: 4, kind: input, shape index: {}]   ;;  %s500_s5 = inlined_call_operand.hbm [shape: f32[8,128], index: 5, kind: output, shape index: {}]  }
   0x1   :  { %11 = vsyncpa [#allocation6], 0  ;;  %s28_s20 = sshll.u32 %s496_s1, 4  ;;  %s29_s20 = int_to_ptr.hbm [resolvable:$true] %s28_s20 }
   0x2   :  { %12 = vsyncpa [#allocation4], 0  ;;  %s441_s21 = smov [#allocation5]   ;;  %s18_s25 = sshll.u32 %s495_s0, 4  ;;  %s19_s25 = int_to_ptr.hbm [resolvable:$true] %s18_s25 }
   0x3   :  { %s30_s22 = sshll.u32 %s441_s21, 4  ;;  %s442_s26 = smov 64   ;;  %s31_s22 = int_to_ptr.vmem [resolvable:$true] %s30_s22 }
   0x4   :  { %s443_s27 = smov 4   ;;  %s444_s28 = smov [#allocation2]  }
   0x5   :  { %36 = dma.hbm_to_vmem [thread:$0]  %s29_s20, 1024, %s31_s22, [#allocation6], %s442_s26, %s442_s26, %s443_s27  }
   0x6   :  { %s20_s29 = sshll.u32 %s444_s28, 4  ;;  %s43_s7 = sshll.u32 %s498_s3, 4  ;;  %s21_s29 = int_to_ptr.vmem [resolvable:$true] %s20_s29  ;;  %s44_s7 = int_to_ptr.hbm [resolvable:$true] %s43_s7 }
   0x7   :  { %23 = dma.hbm_to_vmem [thread:$0]  %s19_s25, 128, %s21_s29, [#allocation3]  }
   0x8   :  { %s445_s1 = smov [#allocation7]  }
   0x9   :  { %s45_s8 = sshll.u32 %s445_s1, 4  ;;  %s46_s8 = int_to_ptr.vmem [resolvable:$true] %s45_s8 }
   0xa   :  { %51 = dma.hbm_to_vmem [thread:$0]  %s44_s7, 1024, %s46_s8, [#allocation6], %s442_s26, %s442_s26, %s443_s27  }
   0xb   :  { %435 = dma.done.wait [#allocation3], 128  }
   0xc   :  { %436 = vsyncadd [#allocation3], 4294967168 }
   0xd   :  { %437 = dma.done.wait [#allocation6], 2048  }
   0xe   :  { %438 = vsyncadd [#allocation6], 4294965248  ;;  %v322_v0 = vld [vmem:[#allocation5 + $0x38] sm:$0xff]  ;;  %v321_v1 = vld [vmem:[#allocation5 + $0x30] sm:$0xff]  ;;  %s446_s11 = smov [#allocation8]   ;;  %s240_s15 = sshll.u32 %s500_s5, 4  ;;  %s241_s15 = int_to_ptr.hbm [resolvable:$true] %s240_s15 }
   0xf   :  { %136 = vmatpush.bf16.msra.mxu0 %v322_v0  ;;  %v330_v2 = vld [vmem:[#allocation7 + $0x38] sm:$0xff]  ;;  %v329_v3 = vld [vmem:[#allocation7 + $0x30] sm:$0xff]  ;;  %v320_v4 = vld [vmem:[#allocation5 + $0x28] sm:$0xff]  ;;  %s238_s12 = sshll.u32 %s446_s11, 4  ;;  %s239_s12 = int_to_ptr.vmem [resolvable:$true] %s238_s12 }
  0x10   :  { %219 = vmatpush.bf16.msra.mxu1 %v330_v2  ;;  %v328_v5 = vld [vmem:[#allocation7 + $0x28] sm:$0xff]  ;;  %v319_v6 = vld [vmem:[#allocation5 + $0x20] sm:$0xff]  ;;  %v318_v8 = vld [vmem:[#allocation5 + $0x18] sm:$0xff] }
  0x11   :  { %v327_v7 = vld [vmem:[#allocation7 + $0x20] sm:$0xff]  ;;  %v326_v9 = vld [vmem:[#allocation7 + $0x18] sm:$0xff]  ;;  %v317_v10 = vld [vmem:[#allocation5 + $0x10] sm:$0xff] }
  0x12   :  { %v325_v11 = vld [vmem:[#allocation7 + $0x10] sm:$0xff]  ;;  %v316_v12 = vld [vmem:[#allocation5 + $0x8] sm:$0xff]  ;;  %v315_v13 = vld [vmem:[#allocation5] sm:$0xff] }
  0x13   :  { %137 = vmatpush.bf16.msra.mxu0 %v321_v1  ;;  %v66_v14 = vld [vmem:[#allocation2] sm:$0xff]  ;;  %v324_v16 = vld [vmem:[#allocation7 + $0x8] sm:$0xff]  ;;  %v323_v17 = vld [vmem:[#allocation7] sm:$0xff] }
  0x14   :  { %220 = vmatpush.bf16.msra.mxu1 %v329_v3  ;;  %v67_v15 = vpack.c.bf16 %v66_v14, %v66_v14  ;;  %v337_v18 = vld [vmem:[%s497_s2] ss:$0 sm:$0xff] }
  0x15   :  { %v338_v24 = vld [vmem:[%s499_s4] ss:$0 sm:$0xff] }
  0x17   :  { %138 = vmatpush.bf16.msra.mxu0 %v320_v4 }
  0x18   :  { %221 = vmatpush.bf16.msra.mxu1 %v328_v5 }
  0x1b   :  { %139 = vmatpush.bf16.msra.mxu0 %v319_v6 }
  0x1c   :  { %222 = vmatpush.bf16.msra.mxu1 %v327_v7 }
  0x1f   :  { %140 = vmatpush.bf16.msra.mxu0 %v318_v8 }
  0x20   :  { %223 = vmatpush.bf16.msra.mxu1 %v326_v9 }
  0x23   :  { %141 = vmatpush.bf16.msra.mxu0 %v317_v10 }
  0x24   :  { %224 = vmatpush.bf16.msra.mxu1 %v325_v11 }
  0x27   :  { %142 = vmatpush.bf16.msra.mxu0 %v316_v12 }
  0x28   :  { %225 = vmatpush.bf16.msra.mxu1 %v324_v16 }
  0x2b   :  { %143 = vmatpush.bf16.msra.mxu0 %v315_v13 }
  0x2c   :  { %226 = vmatpush.bf16.msra.mxu1 %v323_v17 }
  0x2e   :  { %144 = vmatmul.bf16.vlgmr.msra.gmra.mxu0 %v67_v15 }
  0xab   :  { %v145_v19 = vpop.f32.mrf.mxu0 }
  0xac   :  { %v146_v20 = vadd.f32 %v337_v18, %v145_v19 }
  0xae   :  { %v149_v21 = vmax.f32 %v146_v20, 0.0 }
  0xb0   :  { %v150_v22 = vpack.c.bf16 %v149_v21, %v149_v21 }
  0xb2   :  { %227 = vmatmul.bf16.vlgmr.msra.gmra.mxu1 %v150_v22 }
  0xb3   :  { %v147_v23 = vpop.f32.mrf.mxu0 }
 0x12f   :  { %v228_v25 = vpop.f32.mrf.mxu1 }
 0x130   :  { %v229_v26 = vadd.f32 %v338_v24, %v228_v25 }
 0x132   :  { %232 = vst [vmem:[#allocation8] sm:$0xff] %v229_v26 }
 0x133   :  { %243 = dma.vmem_to_hbm [thread:$0]  %s239_s12, 128, %s241_s15, [#allocation4]  }
 0x137   :  { %v230_v27 = vpop.f32.mrf.mxu1 }
 0x138   :  { %439 = dma.done.wait [#allocation4], 128  }
 0x139   :  { %440 = vsyncadd [#allocation4], 4294967168 }
 0x13a   :  { %248 = vsyncpa [#allocation3], 1 }
 0x13b   :  { %249 = vsyncpa [#allocation6], 1 }
 0x13c   :  { %250 = vsyncpa [#allocation4], 1 }

</bundles_post_ra>
